<compile_context>
chip_gen: v5e
topology: v5e:2x2
jax: 0.10.0
libtpu: 0.0.40
codegen_flags: <defaults>
</compile_context>

<pallas_src>
import jax
import jax.numpy as jnp
from jax.experimental import pallas as pl
from jax.experimental.pallas import tpu as pltpu


# ----------------------------- helpers -------------------------------------

def _round_up(n, m):
    return (n + m - 1) // m * m


def _pad_last(a, to):
    pad = to - a.shape[-1]
    if pad == 0:
        return a
    cfg = [(0, 0)] * (a.ndim - 1) + [(0, pad)]
    return jnp.pad(a, cfg)


def _pick_tile(s, max_tile):
    """Largest legal lane tile: the full axis if it fits, otherwise the biggest
    multiple-of-128 divisor of `s` (so no padding copy is needed)."""
    max_tile = max(128, (max_tile // 128) * 128)     # defensively 128-align
    if s <= max_tile:
        return s                                     # block == full dim: legal
    for t in range(max_tile, 127, -128):
        if s % t == 0:
            return t
    return max_tile                                  # fallback: pad (rare shapes)


def _vmem_limit(block_bytes):
    # double-buffered pipeline blocks + headroom, kept under v7x's 64 MiB VMEM.
    return int(min(max(2 * block_bytes + (8 << 20), 32 << 20), 60 << 20))


# ----------------------------- Pallas kernels ------------------------------

def _attention_kernel(p_ref, phi_ref, wth_ref, psiw_ref, psib_ref, o_ref):
    # theta(x) on this coarse-spatial tile: (inter, 8C) @ (8C, TILE), bf16 in,
    # f32 accumulate on the MXU.
    theta = jnp.dot(wth_ref[...], p_ref[0], preferred_element_type=jnp.float32)
    f = jnp.maximum(theta + phi_ref[0].astype(jnp.float32), 0.0)
    # psi is a K=inter, N=1 projection: VPU multiply + sublane reduce keeps the
    # MXU free and avoids a (n,1) masked-store layout.
    logit = jnp.sum(f * psiw_ref[...], axis=0, keepdims=True) + psib_ref[...]
    o_ref[0] = jax.nn.sigmoid(logit).astype(o_ref.dtype)   # (1, TILE) lane-dense


def attention_map(patches, phi_up, theta_mat, psi_w, psi_b, max_tile=16384):
    # patches: (B, 8C, Sc) bf16   phi_up: (B, inter, Sc) bf16  ->  (B, 1, Sc) f32
    B, K, Sc = patches.shape
    inter = theta_mat.shape[0]
    tile = _pick_tile(Sc, max_tile)
    sp = _round_up(Sc, tile)
    if sp != Sc:                                   # rare fallback: pad copy
        patches = _pad_last(patches, sp)
        phi_up = _pad_last(phi_up, sp)
    block_bytes = (K * tile * patches.dtype.itemsize
                   + inter * tile * phi_up.dtype.itemsize
                   + tile * 4)
    att = pl.pallas_call(
        _attention_kernel,
        out_shape=jax.ShapeDtypeStruct((B, 1, sp), jnp.float32),
        grid=(B, sp // tile),
        in_specs=[
            pl.BlockSpec((1, K, tile), lambda b, i: (b, 0, i)),
            pl.BlockSpec((1, inter, tile), lambda b, i: (b, 0, i)),
            pl.BlockSpec((inter, K), lambda b, i: (0, 0)),
            pl.BlockSpec((inter, 1), lambda b, i: (0, 0)),
            pl.BlockSpec((1, 1), lambda b, i: (0, 0)),
        ],
        out_specs=pl.BlockSpec((1, 1, tile), lambda b, i: (b, 0, i)),
        compiler_params=pltpu.CompilerParams(
            dimension_semantics=("parallel", "parallel"),
            vmem_limit_bytes=_vmem_limit(block_bytes),
            # Let XLA fuse the stride-2 im2col reshape/transpose(+bf16 cast)
            # into this operand's input DMA instead of materialising it in HBM.
            allow_input_fusion=[True, False, False, False, False]),
    )(patches, phi_up, theta_mat, psi_w, psi_b)
    if sp != Sc:
        att = att[:, :, :Sc]
    return att


def _gate_combine_kernel(x_ref, att_ref, w1_ref, b1_ref, w2_ref, b2_ref, o_ref):
    # y = attention * x ; W_y = conv1x1+BN (folded) ; out = relu(conv1x1+BN(W_y))
    y = x_ref[0] * att_ref[0]                                    # (C, TILE)
    wy = jnp.dot(w1_ref[...], y, preferred_element_type=jnp.float32) + b1_ref[...]
    z = jnp.dot(w2_ref[...], wy, preferred_element_type=jnp.float32) + b2_ref[...]
    o_ref[0] = jnp.maximum(z, 0.0).astype(o_ref.dtype)


def gate_combine(x, att, w1, b1, w2, b2, max_tile=65536):
    # x: (B, C, S)  att: (B, 1, S)  w*: (C, C)  b*: (C, 1)  ->  (B, C, S)
    B, C, S = x.shape
    tile = _pick_tile(S, max_tile)
    sp = _round_up(S, tile)
    if sp != S:                                    # rare fallback: pad copy
        x = _pad_last(x, sp)
        att = _pad_last(att, sp)
    block_bytes = (C * tile * x.dtype.itemsize
                   + tile * att.dtype.itemsize
                   + C * tile * 4)
    out = pl.pallas_call(
        _gate_combine_kernel,
        out_shape=jax.ShapeDtypeStruct((B, C, sp), jnp.float32),
        grid=(B, sp // tile),
        in_specs=[
            pl.BlockSpec((1, C, tile), lambda b, i: (b, 0, i)),
            pl.BlockSpec((1, 1, tile), lambda b, i: (b, 0, i)),
            pl.BlockSpec((C, C), lambda b, i: (0, 0)),
            pl.BlockSpec((C, 1), lambda b, i: (0, 0)),
            pl.BlockSpec((C, C), lambda b, i: (0, 0)),
            pl.BlockSpec((C, 1), lambda b, i: (0, 0)),
        ],
        out_specs=pl.BlockSpec((1, C, tile), lambda b, i: (b, 0, i)),
        compiler_params=pltpu.CompilerParams(
            dimension_semantics=("parallel", "parallel"),
            vmem_limit_bytes=_vmem_limit(block_bytes)),
    )(x, att, w1, b1, w2, b2)
    if sp != S:
        out = out[:, :, :S]
    return out


# ----------------------------- JAX glue ------------------------------------

def _linear_resize_axis(x, out_size, axis):
    # Matches F.interpolate(..., mode='trilinear', align_corners=False).
    in_size = x.shape[axis]
    if out_size == in_size:
        return x
    scale = in_size / out_size
    dst = jnp.arange(out_size, dtype=jnp.float32)
    src = jnp.maximum((dst + 0.5) * scale - 0.5, 0.0)
    i0 = jnp.minimum(jnp.floor(src).astype(jnp.int32), in_size - 1)
    i1 = jnp.minimum(i0 + 1, in_size - 1)
    w1 = src - i0.astype(jnp.float32)
    w0 = 1.0 - w1
    shape = [1] * x.ndim
    shape[axis] = out_size
    return (jnp.take(x, i0, axis=axis) * w0.reshape(shape)
            + jnp.take(x, i1, axis=axis) * w1.reshape(shape))


def trilinear_resize_ncdhw(x, out_spatial):
    # x: (B, C, T, H, W) channels-first.
    # TODO(synk): trilinear interpolation stays in XLA; a Pallas version would
    # need cross-tile neighbour gathers.
    for ax, s in zip((2, 3, 4), out_spatial):
        x = _linear_resize_axis(x, s, ax)
    return x


def init_params(key, in_size, gate_size, inter_size):
    ks = jax.random.split(key, 12)

    def u(k, shape, fan_in):
        bound = 1.0 / (fan_in ** 0.5)
        return jax.random.uniform(k, shape, jnp.float32, -bound, bound)

    p = {}
    # theta: Conv3d(in, inter, kernel=2, stride=2, bias=False)
    p['theta_w'] = u(ks[0], (inter_size, in_size, 2, 2, 2), in_size * 8)
    # phi: Conv3d(gate, inter, 1, bias=True)
    p['phi_w'] = u(ks[1], (inter_size, gate_size, 1, 1, 1), gate_size)
    p['phi_b'] = u(ks[2], (inter_size,), gate_size)
    # psi: Conv3d(inter, 1, 1, bias=True)
    p['psi_w'] = u(ks[3], (1, inter_size, 1, 1, 1), inter_size)
    p['psi_b'] = u(ks[4], (1,), inter_size)
    # W: Conv3d(in, in, 1) + BatchNorm3d(in)
    p['W_w'] = u(ks[5], (in_size, in_size, 1, 1, 1), in_size)
    p['W_b'] = u(ks[6], (in_size,), in_size)
    p['W_bn_gamma'] = 1.0 + 0.1 * jax.random.normal(ks[7], (in_size,), jnp.float32)
    p['W_bn_beta'] = 0.1 * jax.random.normal(ks[8], (in_size,), jnp.float32)
    p['W_bn_mean'] = jnp.zeros((in_size,), jnp.float32)
    p['W_bn_var'] = jnp.ones((in_size,), jnp.float32)
    # combine_gates: Conv3d(in, in, 1) + BatchNorm3d(in) + ReLU
    p['cmb_w'] = u(ks[9], (in_size, in_size, 1, 1, 1), in_size)
    p['cmb_b'] = u(ks[10], (in_size,), in_size)
    p['cmb_bn_gamma'] = 1.0 + 0.1 * jax.random.normal(ks[11], (in_size,), jnp.float32)
    p['cmb_bn_beta'] = jnp.zeros((in_size,), jnp.float32)
    p['cmb_bn_mean'] = jnp.zeros((in_size,), jnp.float32)
    p['cmb_bn_var'] = jnp.ones((in_size,), jnp.float32)
    return p


def single_attention_block(x_ncdhw, g_ncdhw, p, stream_dtype=jnp.bfloat16):
    """x: (B, C, T, H, W), g: (B, Cg, Tg, Hg, Wg)  (PyTorch NCDHW)."""
    # TODO(synk): BatchNorm is implemented in eval mode (running stats folded
    # into the 1x1 convs); training-mode batch-statistics BN is not replicated.
    B, C, T, H, W = x_ncdhw.shape
    _, Cg, Tg, Hg, Wg = g_ncdhw.shape
    inter = p['phi_w'].shape[0]
    eps = 1e-5
    assert T % 2 == 0 and H % 2 == 0 and W % 2 == 0, "stride-2 theta needs even spatial dims"

    Td, Hd, Wd = T // 2, H // 2, W // 2
    S, Sc, Sg = T * H * W, Td * Hd * Wd, Tg * Hg * Wg

    # ---- theta patches: channels-first im2col for the 2x2x2/stride-2 conv ----
    # TODO(synk): the stride-2 gather itself stays an XLA transpose; it is
    # streamed bf16 and flagged allow_input_fusion so XLA can fold it into the
    # attention kernel's input DMA (an in-kernel strided gather is not a
    # rectangular BlockSpec window).
    patches = x_ncdhw.reshape(B, C, Td, 2, Hd, 2, Wd, 2)
    patches = jnp.transpose(patches, (0, 1, 3, 5, 7, 2, 4, 6))
    patches = patches.reshape(B, 8 * C, Sc).astype(stream_dtype)
    theta_mat = p['theta_w'].reshape(inter, 8 * C).astype(stream_dtype)

    # ---- phi(g): tiny 1x1x1 conv + trilinear upsample in plain XLA ----
    phi_g = jnp.einsum('oc,bcs->bos', p['phi_w'].reshape(inter, Cg),
                       g_ncdhw.reshape(B, Cg, Sg),
                       preferred_element_type=jnp.float32)
    phi_g = phi_g + p['phi_b'].reshape(1, inter, 1)
    phi_g = phi_g.reshape(B, inter, Tg, Hg, Wg)
    phi_up = trilinear_resize_ncdhw(phi_g, (Td, Hd, Wd))
    phi_up = phi_up.reshape(B, inter, Sc).astype(stream_dtype)

    # ---- fused theta + add + relu + psi + sigmoid (Pallas) ----
    att_c = attention_map(patches, phi_up, theta_mat,
                          p['psi_w'].reshape(inter, 1),
                          p['psi_b'].reshape(1, 1))
    att_c = att_c.reshape(B, 1, Td, Hd, Wd)

    # ---- upsample attention to input spatial size (also a module output) ----
    att_full = trilinear_resize_ncdhw(att_c, (T, H, W))        # (B, 1, T, H, W)

    # ---- fold BN (eval) into the 1x1 conv weights on the host side ----
    def bn_fold(w, b, gamma, beta, mean, var):
        s = gamma / jnp.sqrt(var + eps)
        return w * s[:, None], (b * s + (beta - mean * s))[:, None]

    w1f, b1f = bn_fold(p['W_w'].reshape(C, C), p['W_b'],
                       p['W_bn_gamma'], p['W_bn_beta'],
                       p['W_bn_mean'], p['W_bn_var'])
    w2f, b2f = bn_fold(p['cmb_w'].reshape(C, C), p['cmb_b'],
                       p['cmb_bn_gamma'], p['cmb_bn_beta'],
                       p['cmb_bn_mean'], p['cmb_bn_var'])

    # ---- fused  y = att*x ; conv+BN ; conv+BN+ReLU  (Pallas) ----
    out = gate_combine(x_ncdhw.reshape(B, C, S), att_full.reshape(B, 1, S),
                       w1f, b1f, w2f, b2f)
    out = out.reshape(B, C, T, H, W)
    return out, att_full


# ----------------------------- Driver --------------------------------------

if __name__ == "__main__":
    B, C, T, H, W = 2, 8, 16, 16, 16      # in_size = 8
    Cg = 16                               # gate_size = 16
    inter = 4                             # inter_size = 4
    key = jax.random.PRNGKey(0)
    kx, kg, kp = jax.random.split(key, 3)
    x = jax.random.normal(kx, (B, C, T, H, W), jnp.float32)
    g = jax.random.normal(kg, (B, Cg, 4, 4, 4), jnp.float32)   # gating feature map
    params = init_params(kp, C, Cg, inter)

    out, att = jax.jit(single_attention_block)(x, g, params)
    jax.block_until_ready((out, att))

    assert out.shape == (B, C, T, H, W)
    assert att.shape == (B, 1, T, H, W)
    assert bool(jnp.all(jnp.isfinite(out))) and bool(jnp.all(jnp.isfinite(att)))
    print("KERNEL_OK")
</pallas_src>

<mosaic_0001>
module attributes {stable_mosaic.version = 11 : i64} {
  func.func @_attention_kernel(%arg0: i32, %arg1: i32, %arg2: memref<1x64x512xbf16, #tpu.memory_space<vmem>>, %arg3: memref<1x4x512xbf16, #tpu.memory_space<vmem>>, %arg4: memref<4x64xbf16, #tpu.memory_space<vmem>>, %arg5: memref<4x1xf32, #tpu.memory_space<vmem>>, %arg6: memref<1x1xf32, #tpu.memory_space<vmem>>, %arg7: memref<1x1x512xf32, #tpu.memory_space<vmem>>) attributes {dimension_semantics = [#tpu.dimension_semantics<parallel>, #tpu.dimension_semantics<parallel>], iteration_bounds = array<i64: 2, 1>, scalar_prefetch = 0 : i64, scratch_operands = 0 : i64, tpu.core_type = #tpu.core_type<tc>, window_params = [{transform_indices = @transform_0, window_bounds = array<i64: 1, 64, 512>}, {transform_indices = @transform_1, window_bounds = array<i64: 1, 4, 512>}, {pipeline_mode = #tpu.pipeline_mode<synchronous>, transform_indices = @transform_2, window_bounds = array<i64: 4, 64>}, {pipeline_mode = #tpu.pipeline_mode<synchronous>, transform_indices = @transform_3, window_bounds = array<i64: 4, 1>}, {pipeline_mode = #tpu.pipeline_mode<synchronous>, transform_indices = @transform_4, window_bounds = array<i64: 1, 1>}, {transform_indices = @transform_5, window_bounds = array<i64: 1, 1, 512>}]} {
    %c0 = arith.constant 0 : index
    %c0_0 = arith.constant 0 : index
    %0 = vector.load %arg4[%c0, %c0_0] : memref<4x64xbf16, #tpu.memory_space<vmem>>, vector<4x64xbf16>
    %c0_1 = arith.constant 0 : index
    %c0_2 = arith.constant 0 : index
    %c0_3 = arith.constant 0 : index
    %1 = vector.load %arg2[%c0_1, %c0_2, %c0_3] : memref<1x64x512xbf16, #tpu.memory_space<vmem>>, vector<1x64x512xbf16>
    %2 = vector.shape_cast %1 : vector<1x64x512xbf16> to vector<64x512xbf16>
    %cst = arith.constant dense<0.000000e+00> : vector<4x512xf32>
    %3 = tpu.matmul %0, %2, %cst {dimension_numbers = #tpu.dot_dimension_numbers<[1], [0], [0], [1], [0, 0, 1, 1], [], []>} : vector<4x64xbf16>, vector<64x512xbf16>, vector<4x512xf32> -> vector<4x512xf32>
    %c0_4 = arith.constant 0 : index
    %c0_5 = arith.constant 0 : index
    %c0_6 = arith.constant 0 : index
    %4 = vector.load %arg3[%c0_4, %c0_5, %c0_6] : memref<1x4x512xbf16, #tpu.memory_space<vmem>>, vector<1x4x512xbf16>
    %5 = vector.shape_cast %4 : vector<1x4x512xbf16> to vector<4x512xbf16>
    %6 = arith.extf %5 : vector<4x512xbf16> to vector<4x512xf32>
    %7 = arith.addf %3, %6 : vector<4x512xf32>
    %cst_7 = arith.constant 0.000000e+00 : f32
    %8 = vector.broadcast %cst_7 : f32 to vector<4x512xf32>
    %9 = arith.maximumf %7, %8 : vector<4x512xf32>
    %c0_8 = arith.constant 0 : index
    %c0_9 = arith.constant 0 : index
    %10 = vector.load %arg5[%c0_8, %c0_9] : memref<4x1xf32, #tpu.memory_space<vmem>>, vector<4x1xf32>
    %11 = vector.broadcast %10 : vector<4x1xf32> to vector<4x512xf32>
    %12 = arith.mulf %9, %11 : vector<4x512xf32>
    %cst_10 = arith.constant dense<0.000000e+00> : vector<512xf32>
    %13 = vector.multi_reduction <add>, %12, %cst_10 [0] : vector<4x512xf32> to vector<512xf32>
    %14 = vector.shape_cast %13 : vector<512xf32> to vector<1x512xf32>
    %c0_11 = arith.constant 0 : index
    %c0_12 = arith.constant 0 : index
    %15 = vector.load %arg6[%c0_11, %c0_12] : memref<1x1xf32, #tpu.memory_space<vmem>>, vector<1x1xf32>
    %16 = vector.broadcast %15 : vector<1x1xf32> to vector<1x512xf32>
    %17 = arith.addf %14, %16 : vector<1x512xf32>
    %18 = arith.negf %17 : vector<1x512xf32>
    %19 = math.exp %18 : vector<1x512xf32>
    %cst_13 = arith.constant 1.000000e+00 : f32
    %20 = vector.broadcast %cst_13 : f32 to vector<1x512xf32>
    %21 = arith.addf %20, %19 : vector<1x512xf32>
    %22 = arith.divf %20, %21 : vector<1x512xf32>
    %c0_14 = arith.constant 0 : index
    %c0_15 = arith.constant 0 : index
    %c0_16 = arith.constant 0 : index
    %23 = vector.load %arg7[%c0_14, %c0_15, %c0_16] : memref<1x1x512xf32, #tpu.memory_space<vmem>>, vector<1x1x512xf32>
    %24 = vector.shape_cast %23 : vector<1x1x512xf32> to vector<1x512xf32>
    %25 = vector.shape_cast %22 : vector<1x512xf32> to vector<1x1x512xf32>
    tpu.vector_store %arg7[%c0_14, %c0_15, %c0_16], %25 {strides = array<i32>} : memref<1x1x512xf32, #tpu.memory_space<vmem>>, vector<1x1x512xf32>,
    return
  }
  func.func @transform_0(%arg0: i32, %arg1: i32) -> (i32, i32, i32) {
    %c0_i32 = arith.constant 0 : i32
    %c0_i32_0 = arith.constant 0 : i32
    return %arg0, %c0_i32, %arg1 : i32, i32, i32
  }
  func.func @transform_1(%arg0: i32, %arg1: i32) -> (i32, i32, i32) {
    %c0_i32 = arith.constant 0 : i32
    %c0_i32_0 = arith.constant 0 : i32
    return %arg0, %c0_i32, %arg1 : i32, i32, i32
  }
  func.func @transform_2(%arg0: i32, %arg1: i32) -> (i32, i32) {
    %c0_i32 = arith.constant 0 : i32
    %c0_i32_0 = arith.constant 0 : i32
    %c0_i32_1 = arith.constant 0 : i32
    return %c0_i32, %c0_i32_0 : i32, i32
  }
  func.func @transform_3(%arg0: i32, %arg1: i32) -> (i32, i32) {
    %c0_i32 = arith.constant 0 : i32
    %c0_i32_0 = arith.constant 0 : i32
    %c0_i32_1 = arith.constant 0 : i32
    return %c0_i32, %c0_i32_0 : i32, i32
  }
  func.func @transform_4(%arg0: i32, %arg1: i32) -> (i32, i32) {
    %c0_i32 = arith.constant 0 : i32
    %c0_i32_0 = arith.constant 0 : i32
    %c0_i32_1 = arith.constant 0 : i32
    return %c0_i32, %c0_i32_0 : i32, i32
  }
  func.func @transform_5(%arg0: i32, %arg1: i32) -> (i32, i32, i32) {
    %c0_i32 = arith.constant 0 : i32
    %c0_i32_0 = arith.constant 0 : i32
    return %arg0, %c0_i32, %arg1 : i32, i32, i32
  }
}

module attributes {stable_mosaic.version = 11 : i64} {
  func.func @_gate_combine_kernel(%arg0: i32, %arg1: i32, %arg2: memref<1x8x4096xf32, #tpu.memory_space<vmem>>, %arg3: memref<1x1x4096xf32, #tpu.memory_space<vmem>>, %arg4: memref<8x8xf32, #tpu.memory_space<vmem>>, %arg5: memref<8x1xf32, #tpu.memory_space<vmem>>, %arg6: memref<8x8xf32, #tpu.memory_space<vmem>>, %arg7: memref<8x1xf32, #tpu.memory_space<vmem>>, %arg8: memref<1x8x4096xf32, #tpu.memory_space<vmem>>) attributes {dimension_semantics = [#tpu.dimension_semantics<parallel>, #tpu.dimension_semantics<parallel>], iteration_bounds = array<i64: 2, 1>, scalar_prefetch = 0 : i64, scratch_operands = 0 : i64, tpu.core_type = #tpu.core_type<tc>, window_params = [{transform_indices = @transform_0, window_bounds = array<i64: 1, 8, 4096>}, {transform_indices = @transform_1, window_bounds = array<i64: 1, 1, 4096>}, {pipeline_mode = #tpu.pipeline_mode<synchronous>, transform_indices = @transform_2, window_bounds = array<i64: 8, 8>}, {pipeline_mode = #tpu.pipeline_mode<synchronous>, transform_indices = @transform_3, window_bounds = array<i64: 8, 1>}, {pipeline_mode = #tpu.pipeline_mode<synchronous>, transform_indices = @transform_4, window_bounds = array<i64: 8, 8>}, {pipeline_mode = #tpu.pipeline_mode<synchronous>, transform_indices = @transform_5, window_bounds = array<i64: 8, 1>}, {transform_indices = @transform_6, window_bounds = array<i64: 1, 8, 4096>}]} {
    %c0 = arith.constant 0 : index
    %c0_0 = arith.constant 0 : index
    %c0_1 = arith.constant 0 : index
    %0 = vector.load %arg2[%c0, %c0_0, %c0_1] : memref<1x8x4096xf32, #tpu.memory_space<vmem>>, vector<1x8x4096xf32>
    %1 = vector.shape_cast %0 : vector<1x8x4096xf32> to vector<8x4096xf32>
    %c0_2 = arith.constant 0 : index
    %c0_3 = arith.constant 0 : index
    %c0_4 = arith.constant 0 : index
    %2 = vector.load %arg3[%c0_2, %c0_3, %c0_4] : memref<1x1x4096xf32, #tpu.memory_space<vmem>>, vector<1x1x4096xf32>
    %3 = vector.shape_cast %2 : vector<1x1x4096xf32> to vector<1x4096xf32>
    %4 = vector.broadcast %3 : vector<1x4096xf32> to vector<8x4096xf32>
    %5 = arith.mulf %1, %4 : vector<8x4096xf32>
    %c0_5 = arith.constant 0 : index
    %c0_6 = arith.constant 0 : index
    %6 = vector.load %arg4[%c0_5, %c0_6] : memref<8x8xf32, #tpu.memory_space<vmem>>, vector<8x8xf32>
    %cst = arith.constant dense<0.000000e+00> : vector<8x4096xf32>
    %7 = tpu.matmul %6, %5, %cst {dimension_numbers = #tpu.dot_dimension_numbers<[1], [0], [0], [1], [0, 0, 1, 1], [], []>} : vector<8x8xf32>, vector<8x4096xf32>, vector<8x4096xf32> -> vector<8x4096xf32>
    %c0_7 = arith.constant 0 : index
    %c0_8 = arith.constant 0 : index
    %8 = vector.load %arg5[%c0_7, %c0_8] : memref<8x1xf32, #tpu.memory_space<vmem>>, vector<8x1xf32>
    %9 = vector.broadcast %8 : vector<8x1xf32> to vector<8x4096xf32>
    %10 = arith.addf %7, %9 : vector<8x4096xf32>
    %c0_9 = arith.constant 0 : index
    %c0_10 = arith.constant 0 : index
    %11 = vector.load %arg6[%c0_9, %c0_10] : memref<8x8xf32, #tpu.memory_space<vmem>>, vector<8x8xf32>
    %cst_11 = arith.constant dense<0.000000e+00> : vector<8x4096xf32>
    %12 = tpu.matmul %11, %10, %cst_11 {dimension_numbers = #tpu.dot_dimension_numbers<[1], [0], [0], [1], [0, 0, 1, 1], [], []>} : vector<8x8xf32>, vector<8x4096xf32>, vector<8x4096xf32> -> vector<8x4096xf32>
    %c0_12 = arith.constant 0 : index
    %c0_13 = arith.constant 0 : index
    %13 = vector.load %arg7[%c0_12, %c0_13] : memref<8x1xf32, #tpu.memory_space<vmem>>, vector<8x1xf32>
    %14 = vector.broadcast %13 : vector<8x1xf32> to vector<8x4096xf32>
    %15 = arith.addf %12, %14 : vector<8x4096xf32>
    %cst_14 = arith.constant 0.000000e+00 : f32
    %16 = vector.broadcast %cst_14 : f32 to vector<8x4096xf32>
    %17 = arith.maximumf %15, %16 : vector<8x4096xf32>
    %c0_15 = arith.constant 0 : index
    %c0_16 = arith.constant 0 : index
    %c0_17 = arith.constant 0 : index
    %18 = vector.load %arg8[%c0_15, %c0_16, %c0_17] : memref<1x8x4096xf32, #tpu.memory_space<vmem>>, vector<1x8x4096xf32>
    %19 = vector.shape_cast %18 : vector<1x8x4096xf32> to vector<8x4096xf32>
    %20 = vector.shape_cast %17 : vector<8x4096xf32> to vector<1x8x4096xf32>
    tpu.vector_store %arg8[%c0_15, %c0_16, %c0_17], %20 {strides = array<i32>} : memref<1x8x4096xf32, #tpu.memory_space<vmem>>, vector<1x8x4096xf32>,
    return
  }
  func.func @transform_0(%arg0: i32, %arg1: i32) -> (i32, i32, i32) {
    %c0_i32 = arith.constant 0 : i32
    %c0_i32_0 = arith.constant 0 : i32
    return %arg0, %c0_i32, %arg1 : i32, i32, i32
  }
  func.func @transform_1(%arg0: i32, %arg1: i32) -> (i32, i32, i32) {
    %c0_i32 = arith.constant 0 : i32
    %c0_i32_0 = arith.constant 0 : i32
    return %arg0, %c0_i32, %arg1 : i32, i32, i32
  }
  func.func @transform_2(%arg0: i32, %arg1: i32) -> (i32, i32) {
    %c0_i32 = arith.constant 0 : i32
    %c0_i32_0 = arith.constant 0 : i32
    %c0_i32_1 = arith.constant 0 : i32
    return %c0_i32, %c0_i32_0 : i32, i32
  }
  func.func @transform_3(%arg0: i32, %arg1: i32) -> (i32, i32) {
    %c0_i32 = arith.constant 0 : i32
    %c0_i32_0 = arith.constant 0 : i32
    %c0_i32_1 = arith.constant 0 : i32
    return %c0_i32, %c0_i32_0 : i32, i32
  }
  func.func @transform_4(%arg0: i32, %arg1: i32) -> (i32, i32) {
    %c0_i32 = arith.constant 0 : i32
    %c0_i32_0 = arith.constant 0 : i32
    %c0_i32_1 = arith.constant 0 : i32
    return %c0_i32, %c0_i32_0 : i32, i32
  }
  func.func @transform_5(%arg0: i32, %arg1: i32) -> (i32, i32) {
    %c0_i32 = arith.constant 0 : i32
    %c0_i32_0 = arith.constant 0 : i32
    %c0_i32_1 = arith.constant 0 : i32
    return %c0_i32, %c0_i32_0 : i32, i32
  }
  func.func @transform_6(%arg0: i32, %arg1: i32) -> (i32, i32, i32) {
    %c0_i32 = arith.constant 0 : i32
    %c0_i32_0 = arith.constant 0 : i32
    return %arg0, %c0_i32, %arg1 : i32, i32, i32
  }
}

</mosaic_0001>

<bundles_post_ra>
// kernel: single_attention_block.2
= control target key start
LH: loop header
LB: loop body
LE: loop exit
PB: predicated region body
PF: predicated region fallthrough
CT: control target
= control target key end

     0   :  { %s920_s20 = smov 0   ;;  %s922_s21 = smov 0   ;;  %s1041_s0 = inlined_call_operand.vmem [shape: bf16[2,64,512], index: 0, kind: input, shape index: {}]   ;;  %s1042_s1 = inlined_call_operand.vmem [shape: bf16[2,4,512], index: 1, kind: input, shape index: {}]   ;;  %s1043_s2 = inlined_call_operand.vmem [shape: bf16[4,64], index: 2, kind: input, shape index: {}]   ;;  %s1044_s3 = inlined_call_operand.vmem [shape: f32[4,1], index: 3, kind: input, shape index: {}]   ;;  %s1045_s4 = inlined_call_operand.<no memory space> [shape: f32[1,1], index: 4, kind: input, shape index: {}]   ;;  %s1046_s5 = inlined_call_operand.vmem [shape: f32[2,1,512], index: 5, kind: output, shape index: {}]  }
   0x1   :  { %v10_v0 = vstv %s1045_s4  ;;  %s924_s22 = smov 0  }
   0x2   :  { %11 = vst [vmem:[#allocation2] sm:$0x1] %v10_v0 }
   0x3 LB: > { %s29_s4 = sadd.s32 1, %s880_s21  ;;  %p722_p0 = scmp.ge.s32.totalorder %s884_s22, 1  ;;  %s884_s22 = sphi %s924_s22, %s17_s22   ;;  %s880_s21 = sphi %s922_s21, %s1054_s21   ;;  %s876_s20 = sphi %s920_s20, %s1053_s20  }
   0x4   : > { %p31_p1 = scmp.ge.s32.totalorder %s29_s4, 2  ;;  %p227_p2 = scmp.lt.s32.totalorder %s884_s22, 3 }
   0x6   : > { %s1056_s4 = smov (%p31_p1, %s29_s4), 0  ;;  %p228_p3 = pnand %p722_p0, %p227_p2 }
   0x7   : > { %p272_p4 = scmp.lt.s32.totalorder (!%p228_p3), %s876_s20, 1 }
   0x8   : > { %231 = sbr.rel (%p228_p3) target bundleno = 222 (0xde), region = 40 }
   0xd   : > { %v886_v1 = vmov 0   ;;  %v474_v2 = vld [vmem:[%s1044_s3] sm:$0xf]  ;;  %s1058_s20 = smov (!%p272_p4, %s876_s20), 1  ;;  %v513_v6 = vld [vmem:[#allocation2] sm:$0x1] }
   0xe   : > { %845 = vset.pattern.permute.xlu0 %v886_v1  ;;  %s802_s25 = sshll.u32 %s1058_s20, 7  ;;  %s803_s29 = sshll.u32 %s1058_s20, 3  ;;  %v301_v54 = vld [vmem:[%s1043_s2] sm:$0x3]  ;;  %vm414_vm0 = vcmask 523264   ;;  %vm484_vm1 = vcmask 1043456  }
   0xf   : > { %477 = vperm.xlu0 %845, %v474_v2   ;;  %s947_s28 = scalar_lea.vmem %s1041_s0, %s802_s25  ;;  %s289_s7 = scalar_lea.vmem %s1042_s1, %s803_s29 }
  0x10   : > { %v778_v3 = vld [vmem:[%s947_s28 + $0x60] sm:$0xf]  ;;  %v818_v4 = vld [vmem:[%s947_s28 + $0x6c] sm:$0xf0]  ;;  %v816_v5 = vld [vmem:[%s947_s28 + $0x64] sm:$0xf] }
  0x11   : > { %v779_v7 = vor.u32 %v818_v4, %v778_v3  ;;  %v780_v8 = vld [vmem:[%s947_s28 + $0x70] sm:$0xf0]  ;;  %v786_v9 = vld [vmem:[%s947_s28 + $0x68] sm:$0xf]  ;;  %v819_v10 = vld [vmem:[%s947_s28 + $0x74] sm:$0xf0] }
  0x12   : > { %v783_v11 = vor.u32 %v816_v5, %v780_v8  ;;  %v787_v12 = vor.u32 %v819_v10, %v786_v9  ;;  %v817_v13 = vld [vmem:[%s947_s28 + $0x6c] sm:$0xf]  ;;  %v788_v14 = vld [vmem:[%s947_s28 + $0x78] sm:$0xf0]  ;;  %v762_v15 = vld [vmem:[%s947_s28 + $0x40] sm:$0xf] }
  0x13   : > { %422 = vmatpush.bf16.msra.mxu0 %v779_v7  ;;  %v791_v16 = vor.u32 %v817_v13, %v788_v14  ;;  %v814_v17 = vld [vmem:[%s947_s28 + $0x4c] sm:$0xf0]  ;;  %v812_v18 = vld [vmem:[%s947_s28 + $0x44] sm:$0xf]  ;;  %v764_v19 = vld [vmem:[%s947_s28 + $0x50] sm:$0xf0] }
  0x14   : > { %435 = vmatpush.bf16.msra.mxu1 %v783_v11  ;;  %448 = vmatpush.bf16.msra.mxu2 %v787_v12  ;;  %v763_v20 = vor.u32 %v814_v17, %v762_v15  ;;  %v767_v21 = vor.u32 %v812_v18, %v764_v19  ;;  %v770_v22 = vld [vmem:[%s947_s28 + $0x48] sm:$0xf]  ;;  %v815_v23 = vld [vmem:[%s947_s28 + $0x54] sm:$0xf0]  ;;  %v813_v24 = vld [vmem:[%s947_s28 + $0x4c] sm:$0xf] }
  0x15   : > { %461 = vmatpush.bf16.msra.mxu3 %v791_v16  ;;  %v771_v25 = vor.u32 %v815_v23, %v770_v22  ;;  %v772_v26 = vld [vmem:[%s947_s28 + $0x58] sm:$0xf0]  ;;  %v746_v27 = vld [vmem:[%s947_s28 + $0x20] sm:$0xf]  ;;  %v810_v28 = vld [vmem:[%s947_s28 + $0x2c] sm:$0xf0] }
  0x16   : > { %v775_v29 = vor.u32 %v813_v24, %v772_v26  ;;  %v808_v30 = vld [vmem:[%s947_s28 + $0x24] sm:$0xf]  ;;  %v748_v31 = vld [vmem:[%s947_s28 + $0x30] sm:$0xf0]  ;;  %v754_v32 = vld [vmem:[%s947_s28 + $0x28] sm:$0xf]  ;;  %v747_v33 = vor.u32 %v810_v28, %v746_v27 }
  0x17   : > { %516 = vperm.xlu0 %845, %v513_v6   ;;  %423 = vmatpush.bf16.msra.mxu0 %v763_v20  ;;  %v811_v34 = vld [vmem:[%s947_s28 + $0x34] sm:$0xf0]  ;;  %v809_v35 = vld [vmem:[%s947_s28 + $0x2c] sm:$0xf]  ;;  %v756_v36 = vld [vmem:[%s947_s28 + $0x38] sm:$0xf0]  ;;  %v751_v37 = vor.u32 %v808_v30, %v748_v31 }
  0x18   : > { %436 = vmatpush.bf16.msra.mxu1 %v767_v21  ;;  %449 = vmatpush.bf16.msra.mxu2 %v771_v25  ;;  %v755_v38 = vor.u32 %v811_v34, %v754_v32  ;;  %v730_v39 = vld [vmem:[%s947_s28] sm:$0xf]  ;;  %v806_v40 = vld [vmem:[%s947_s28 + $0xc] sm:$0xf0]  ;;  %v804_v41 = vld [vmem:[%s947_s28 + $0x4] sm:$0xf]  ;;  %v759_v42 = vor.u32 %v809_v35, %v756_v36 }
  0x19   : > { %462 = vmatpush.bf16.msra.mxu3 %v775_v29  ;;  %v732_v43 = vld [vmem:[%s947_s28 + $0x10] sm:$0xf0]  ;;  %v738_v44 = vld [vmem:[%s947_s28 + $0x8] sm:$0xf]  ;;  %v807_v45 = vld [vmem:[%s947_s28 + $0x14] sm:$0xf0]  ;;  %v731_v49 = vor.u32 %v806_v40, %v730_v39 }
  0x1a   : > { %v805_v46 = vld [vmem:[%s947_s28 + $0xc] sm:$0xf]  ;;  %v740_v47 = vld [vmem:[%s947_s28 + $0x18] sm:$0xf0]  ;;  %v318_v48 = vld [vmem:[%s289_s7] sm:$0xff]  ;;  %v735_v51 = vor.u32 %v804_v41, %v732_v43  ;;  %v739_v52 = vor.u32 %v807_v45, %v738_v44  ;;  %s727_s10 = sshll.u32 %s1058_s20, 2 }
  0x1b   : > { %424 = vmatpush.bf16.msra.mxu0 %v747_v33  ;;  %v319_v50 = vunpack.c.l.bf16 %v318_v48  ;;  %v743_v53 = vor.u32 %v805_v46, %v740_v47  ;;  %v320_v55 = vunpack.c.h.bf16 %v318_v48  ;;  %s298_s13 = scalar_lea.vmem %s1046_s5, %s727_s10 }
  0x1c   : > { %437 = vmatpush.bf16.msra.mxu1 %v751_v37  ;;  %450 = vmatpush.bf16.msra.mxu2 %v755_v38 }
  0x1d   : > { %463 = vmatpush.bf16.msra.mxu3 %v759_v42  ;;  %403 = vst [vmem:[#allocation1] ss:$2 sm:$0xff] %v319_v50 }
  0x1e   : > { %405 = vst [vmem:[#allocation1 + $0x10] ss:$2 sm:$0xff] %v320_v55 }
  0x1f   : > { %425 = vmatpush.bf16.msra.mxu0 %v731_v49 }
  0x20   : > { %438 = vmatpush.bf16.msra.mxu1 %v735_v51  ;;  %451 = vmatpush.bf16.msra.mxu2 %v739_v52 }
  0x21   : > { %464 = vmatpush.bf16.msra.mxu3 %v743_v53 }
  0x22   : > { %792 = vmatmul.msk.bf16.vlgmr.msra.gmra.mxu0 %vm414_vm0, %v301_v54 }
  0x23   : > { %793 = vmatmul.msk.bf16.vlgmr.msra.gmra.mxu1 %vm414_vm0, %v301_v54  ;;  %794 = vmatmul.msk.bf16.vlgmr.msra.gmra.mxu2 %vm414_vm0, %v301_v54 }
  0x24   : > { %795 = vmatmul.msk.bf16.vlgmr.msra.gmra.mxu3 %vm414_vm0, %v301_v54  ;;  %v406_v56 = vld.sshfl [vmem:[#allocation1] sm:$0xff pattern:$0x75316420]  ;;  %v407_v57 = vld.sshfl [vmem:[#allocation1 + $0x8] sm:$0xff pattern:$0x75316420] }
  0x25   : > { %v408_v2 = vld.sshfl [vmem:[#allocation1 + $0x10] sm:$0xff pattern:$0x75316420]  ;;  %v409_v4 = vld.sshfl [vmem:[#allocation1 + $0x18] sm:$0xff pattern:$0x75316420] }
  0x81   : > { %v478_v0 = vpop.permute.xlu0 %477 }
  0x89   : > { %v517_v28 = vpop.permute.xlu0 %516 }
  0x8a   : > { %v519_v37 = vperm.slane %v517_v28, 0 }
  0x9f   : > { %v427_v58 = vpop.f32.mrf.mxu0 }
  0xa0   : > { %v428_v59 = vadd.f32 %v427_v58, %v406_v56  ;;  %v440_v60 = vpop.f32.mrf.mxu1 }
  0xa1   : > { %v441_v61 = vadd.f32 %v440_v60, %v407_v57 }
  0xa2   : > { %v470_v62 = vmax.f32 %v428_v59, 0.0 }
  0xa3   : > { %v471_v63 = vmax.f32 %v441_v61, 0.0 }
  0xa4   : > { %v480_v1 = vmul.f32 %v478_v0, %v470_v62 }
  0xa5   : > { %v481_v3 = vmul.f32 %v478_v0, %v471_v63 }
  0xa6   : > { %v485_v5 = vsel %vm484_vm1, %v480_v1, 0.0  ;;  %v453_v6 = vpop.f32.mrf.mxu2 }
  0xa7   : > { %v486_v7 = vrot.slane %v485_v5, 4  ;;  %v492_v8 = vsel %vm484_vm1, %v481_v3, 0.0  ;;  %v454_v9 = vadd.f32 %v453_v6, %v408_v2  ;;  %v466_v10 = vpop.f32.mrf.mxu3  ;;  %v429_v11 = vpop.f32.mrf.mxu0 }
  0xa8   : > { %v493_v12 = vrot.slane %v492_v8, 4  ;;  %v467_v13 = vadd.f32 %v466_v10, %v409_v4  ;;  %v442_v14 = vpop.f32.mrf.mxu1 }
  0xa9   : > { %v487_v15 = vadd.f32 %v486_v7, %v485_v5  ;;  %v472_v16 = vmax.f32 %v454_v9, 0.0 }
  0xaa   : > { %v494_v17 = vadd.f32 %v493_v12, %v492_v8  ;;  %v473_v18 = vmax.f32 %v467_v13, 0.0 }
  0xab   : > { %v488_v19 = vrot.slane %v487_v15, 2  ;;  %v482_v20 = vmul.f32 %v478_v0, %v472_v16 }
  0xac   : > { %v495_v21 = vrot.slane %v494_v17, 2  ;;  %v483_v22 = vmul.f32 %v478_v0, %v473_v18 }
  0xad   : > { %v489_v23 = vadd.f32 %v488_v19, %v487_v15  ;;  %v499_v24 = vsel %vm484_vm1, %v482_v20, 0.0 }
  0xae   : > { %v496_v25 = vadd.f32 %v495_v21, %v494_v17  ;;  %v500_v26 = vrot.slane %v499_v24, 4  ;;  %v506_v27 = vsel %vm484_vm1, %v483_v22, 0.0  ;;  %v455_v29 = vpop.f32.mrf.mxu2  ;;  %vm607_vm1 = vcmask 1040384  }
  0xaf   : > { %v507_v30 = vrot.slane %v506_v27, 4  ;;  %v490_v31 = vrot.slane %v489_v23, 1  ;;  %v468_v32 = vpop.f32.mrf.mxu3 }
  0xb0   : > { %v501_v33 = vadd.f32 %v500_v26, %v499_v24  ;;  %v497_v34 = vrot.slane %v496_v25, 1 }
  0xb1   : > { %v508_v35 = vadd.f32 %v507_v30, %v506_v27  ;;  %v491_v36 = vadd.f32 %v490_v31, %v489_v23 }
  0xb2   : > { %v502_v38 = vrot.slane %v501_v33, 2  ;;  %v498_v39 = vadd.f32 %v497_v34, %v496_v25 }
  0xb3   : > { %v509_v40 = vrot.slane %v508_v35, 2  ;;  %v520_v41 = vadd.f32 %v519_v37, %v491_v36 }
  0xb4   : > { %v503_v42 = vadd.f32 %v502_v38, %v501_v33  ;;  %v521_v43 = vadd.f32 %v519_v37, %v498_v39 }
  0xb5   : > { %v510_v44 = vadd.f32 %v509_v40, %v508_v35  ;;  %v796_v45 = vmul.f32 -1.442695, %v520_v41  ;;  %v614_v35 = vlaneseq }
  0xb6   : > { %v504_v46 = vrot.slane %v503_v42, 1  ;;  %v797_v47 = vmul.f32 -1.442695, %v521_v43 }
  0xb7   : > { %v511_v48 = vrot.slane %v510_v44, 1  ;;  %846 = vpow2.f32 %v796_v45 }
  0xb8   : > { %v505_v49 = vadd.f32 %v504_v46, %v503_v42  ;;  %848 = vpow2.f32 %v797_v47 }
  0xb9   : > { %v512_v50 = vadd.f32 %v511_v48, %v510_v44 }
  0xba   : > { %v522_v51 = vadd.f32 %v519_v37, %v505_v49 }
  0xbb   : > { %v523_v52 = vadd.f32 %v519_v37, %v512_v50 }
  0xbc   : > { %v798_v53 = vmul.f32 -1.442695, %v522_v51 }
  0xbd   : > { %v847_v54 = vpop.eup %846  ;;  %v799_v55 = vmul.f32 -1.442695, %v523_v52 }
  0xbe   : > { %v849_v56 = vpop.eup %848  ;;  %850 = vpow2.f32 %v798_v53  ;;  %v994_v57 = vadd.f32 1.0, %v847_v54 }
  0xbf   : > { %852 = vpow2.f32 %v799_v55  ;;  %v537_v58 = vadd.f32 1.0, %v849_v56 }
  0xc0   : > { %854 = vrcp.f32 %v994_v57  ;;  %vm545_vm3 = vweird.f32 %v994_v57  ;;  %v549_v28 = vand.u32 2147483647, %v994_v57  ;;  %v551_v29 = vand.u32 2147483648, %v994_v57 }
  0xc1   : > { %856 = vrcp.f32 %v537_v58  ;;  %v564_v7 = vand.u32 2147483647, %v537_v58  ;;  %v566_v8 = vand.u32 2147483648, %v537_v58  ;;  %vm560_vm4 = vweird.f32 %v537_v58 }
  0xc2   : > { %v552_v42 = vor.u32 1.1754944e-38, %v551_v29 }
  0xc3   : > { %vm1007_vm6 = vcmp.eq.f32.partialorder %v564_v7, 8.507059e+37  ;;  %v567_v17 = vor.u32 1.1754944e-38, %v566_v8 }
  0xc4   : > { %v851_v59 = vpop.eup %850 }
  0xc5   : > { %v853_v60 = vpop.eup %852  ;;  %v538_v61 = vadd.f32 1.0, %v851_v59 }
  0xc6   : > { %v997_v62 = vpop.eup %854  ;;  %v539_v63 = vadd.f32 1.0, %v853_v60 }
  0xc7   : > { %v857_v0 = vpop.eup %856  ;;  %858 = vrcp.f32 %v538_v61  ;;  %v541_v1 = vmul.f32 %v997_v62, %v994_v57  ;;  %v579_v18 = vand.u32 2147483647, %v538_v61  ;;  %v581_v19 = vand.u32 2147483648, %v538_v61 }
  0xc8   : > { %v556_v2 = vmul.f32 %v857_v0, %v537_v58  ;;  %860 = vrcp.f32 %v539_v63  ;;  %vm561_vm2 = vweird.f32 %v857_v0  ;;  %vm546_vm8 = vweird.f32 %v997_v62 }
  0xc9   : > { %v542_v4 = vsub.f32 1.0, %v541_v1  ;;  %vm1003_vm5 = vmor %vm560_vm4, %vm561_vm2  ;;  %vm575_vm9 = vweird.f32 %v538_v61  ;;  %v594_v23 = vand.u32 2147483647, %v539_v63  ;;  %v596_v24 = vand.u32 2147483648, %v539_v63 }
  0xca   : > { %v557_v3 = vsub.f32 1.0, %v556_v2  ;;  %v582_v31 = vor.u32 1.1754944e-38, %v581_v19  ;;  %vm1021_vm12 = vmor %vm545_vm3, %vm546_vm8  ;;  %vm580_vm13 = vcmp.eq.f32.partialorder %v579_v18, 8.507059e+37  ;;  %vm590_vm14 = vweird.f32 %v539_v63 }
  0xcb   : > { %v543_v12 = vmul.f32 %v997_v62, %v542_v4  ;;  %vm595_vm0 = vcmp.eq.f32.partialorder %v594_v23, 8.507059e+37  ;;  %v597_v37 = vor.u32 1.1754944e-38, %v596_v24  ;;  %vm609_vm2 = vcmask 1042434  }
  0xcc   : > { %v558_v5 = vmul.f32 %v857_v0, %v557_v3  ;;  %vm611_vm3 = vcmask 1041408   ;;  %vm550_vm4 = vcmp.eq.f32.partialorder %v549_v28, 8.507059e+37 }
  0xcd   : > { %v859_v6 = vpop.eup %858  ;;  %v544_v25 = vadd.f32 %v997_v62, %v543_v12 }
  0xce   : > { %v559_v9 = vadd.f32 %v857_v0, %v558_v5  ;;  %v571_v10 = vmul.f32 %v859_v6, %v538_v61  ;;  %v861_v11 = vpop.eup %860  ;;  %vm576_vm7 = vweird.f32 %v859_v6 }
  0xcf   : > { %v586_v14 = vmul.f32 %v861_v11, %v539_v63  ;;  %vm591_vm10 = vweird.f32 %v861_v11  ;;  %vm577_vm11 = vmor %vm575_vm9, %vm576_vm7  ;;  %v548_v38 = vsel %vm1021_vm12, %v997_v62, %v544_v25 }
  0xd0   : > { %v572_v13 = vsub.f32 1.0, %v571_v10  ;;  %v563_v20 = vsel %vm1003_vm5, %v857_v0, %v559_v9  ;;  %vm592_vm15 = vmor %vm590_vm14, %vm591_vm10  ;;  %vm616_vm5 = vcmp.lt.s32.totalorder %v614_v35, 512  ;;  %v553_v45 = vsel %vm550_vm4, %v552_v42, %v548_v38 }
  0xd1   : > { %v587_v22 = vsub.f32 1.0, %v586_v14  ;;  %v568_v30 = vsel %vm1007_vm6, %v567_v17, %v563_v20 }
  0xd2   : > { %v573_v21 = vmul.f32 %v859_v6, %v572_v13  ;;  %v604_v40 = vrot.slane %v568_v30, 7 }
  0xd3   : > { %v588_v27 = vmul.f32 %v861_v11, %v587_v22 }
  0xd4   : > { %v574_v26 = vadd.f32 %v859_v6, %v573_v21  ;;  %v608_v46 = vsel %vm607_vm1, %v553_v45, %v604_v40 }
  0xd5   : > { %v589_v34 = vadd.f32 %v861_v11, %v588_v27 }
  0xd6   : > { %v578_v33 = vsel %vm577_vm11, %v859_v6, %v574_v26 }
  0xd7   : > { %v583_v36 = vsel %vm580_vm13, %v582_v31, %v578_v33  ;;  %v593_v39 = vsel %vm592_vm15, %v861_v11, %v589_v34 }
  0xd8   : > { %v605_v41 = vrot.slane %v583_v36, 6  ;;  %v598_v43 = vsel %vm595_vm0, %v597_v37, %v593_v39 }
  0xd9   : > { %v606_v44 = vrot.slane %v598_v43, 5 }
  0xdb   : > { %v610_v47 = vsel %vm609_vm2, %v605_v41, %v606_v44 }
  0xdc   : > { %v612_v48 = vsel %vm611_vm3, %v608_v46, %v610_v47 }
  0xdd   : > { %618 = vst.msk [vmem:[%s298_s13] sm:$0xf] %vm616_vm5, %v612_v48 }
  0xde PF: > { %s17_s22 = sadd.s32 1, %s884_s22   ;;  %s1053_s20 = smov %s880_s21 }
  0xdf   : > { %p14_p5 = scmp.ge.s32.totalorder %s17_s22, 4   ;;  %s1054_s21 = smov %s1056_s4 }
  0xe1   :  { %16 = sbr.rel (!%p14_p5) target bundleno = 3 (0x3), region = 74 }

// kernel: single_attention_block.3
= control target key start
LH: loop header
LB: loop body
LE: loop exit
PB: predicated region body
PF: predicated region fallthrough
CT: control target
= control target key end

     0   :  { %s2091_s21 = smov 0   ;;  %s2093_s22 = smov 0   ;;  %s2421_s0 = inlined_call_operand.vmem [shape: f32[2,8,4096], index: 0, kind: input, shape index: {}]   ;;  %s2422_s1 = inlined_call_operand.vmem [shape: f32[2,1,4096], index: 1, kind: input, shape index: {}]   ;;  %s2423_s2 = inlined_call_operand.vmem [shape: f32[8,8], index: 2, kind: input, shape index: {}]   ;;  %s2424_s3 = inlined_call_operand.vmem [shape: f32[8,1], index: 3, kind: input, shape index: {}]   ;;  %s2425_s4 = inlined_call_operand.vmem [shape: f32[8,8], index: 4, kind: input, shape index: {}]   ;;  %s2426_s5 = inlined_call_operand.vmem [shape: f32[8,1], index: 5, kind: input, shape index: {}]   ;;  %s2427_s6 = inlined_call_operand.vmem [shape: f32[2,8,4096], index: 6, kind: output, shape index: {}]  }
   0x1   :  { %s2095_s23 = smov 0  }
   0x2 LB: > { %s28_s24 = sadd.s32 1, %s2049_s22  ;;  %p1931_p0 = scmp.ge.s32.totalorder %s2053_s23, 1  ;;  %s2053_s23 = sphi %s2095_s23, %s16_s23   ;;  %s2049_s22 = sphi %s2093_s22, %s2429_s22   ;;  %s2045_s21 = sphi %s2091_s21, %s2428_s21  }
   0x3   : > { %p30_p1 = scmp.ge.s32.totalorder %s28_s24, 2  ;;  %p249_p2 = scmp.lt.s32.totalorder %s2053_s23, 3 }
   0x5   : > { %s2431_s24 = smov (%p30_p1, %s28_s24), 0  ;;  %p250_p3 = pnand %p1931_p0, %p249_p2 }
   0x6   : > { %p296_p4 = scmp.lt.s32.totalorder (!%p250_p3), %s2045_s21, 1 }
   0x7   : > { %253 = sbr.rel (%p250_p3) target bundleno = 353 (0x161), region = 44 }
   0xc   : > { %v461_v0 = vld [vmem:[%s2424_s3] sm:$0xff]  ;;  %v2055_v1 = vmov 0   ;;  %s2433_s21 = smov (!%p296_p4, %s2045_s21), 1  ;;  %vm467_vm0 = vcmask 64512  }
   0xd   : > { %2030 = vset.pattern.permute.xlu0 %v2055_v1  ;;  %s2003_s27 = sshll.u32 %s2433_s21, 8  ;;  %s1934_s28 = sshll.u32 %s2433_s21, 5  ;;  %v1112_v2 = vld [vmem:[%s2426_s5] sm:$0xff] }
   0xe   : > { %464 = vperm.xlu0 %2030, %v461_v0   ;;  %s2121_s7 = scalar_lea.vmem %s2421_s0, %s2003_s27  ;;  %s2126_s10 = scalar_lea.vmem %s2422_s1, %s1934_s28  ;;  %v2144_v24 = vld [vmem:[%s2423_s2] sm:$0xff] }
   0xf   : > { %v324_v3 = vld [vmem:[%s2121_s7] sm:$0xff]  ;;  %v325_v5 = vld [vmem:[%s2121_s7 + $0x8] sm:$0xff]  ;;  %v326_v8 = vld [vmem:[%s2121_s7 + $0x10] sm:$0xff]  ;;  %s2348_s19 = scalar_lea.vmem %s2427_s6, %s2003_s27 }
  0x10   : > { %v356_v4 = vld [vmem:[%s2126_s10] sm:$0xff]  ;;  %v327_v10 = vld [vmem:[%s2121_s7 + $0x18] sm:$0xff]  ;;  %v329_v14 = vld [vmem:[%s2121_s7 + $0x28] sm:$0xff] }
  0x11   : > { %v364_v6 = vperm.slane %v356_v4, 0  ;;  %v365_v7 = vperm.slane %v356_v4, 1  ;;  %v366_v9 = vperm.slane %v356_v4, 2  ;;  %v367_v11 = vperm.slane %v356_v4, 3  ;;  %v328_v12 = vld [vmem:[%s2121_s7 + $0x20] sm:$0xff]  ;;  %v330_v21 = vld [vmem:[%s2121_s7 + $0x30] sm:$0xff] }
  0x12   : > { %v368_v13 = vperm.slane %v356_v4, 4  ;;  %v369_v15 = vperm.slane %v356_v4, 5  ;;  %v370_v16 = vperm.slane %v356_v4, 6  ;;  %v331_v22 = vld [vmem:[%s2121_s7 + $0x38] sm:$0xff]  ;;  %v357_v23 = vld [vmem:[%s2126_s10 + $0x8] sm:$0xff]  ;;  %v371_v27 = vperm.slane %v356_v4, 7 }
  0x13   : > { %v428_v17 = vmul.f32 %v364_v6, %v324_v3  ;;  %v429_v18 = vmul.f32 %v365_v7, %v325_v5  ;;  %v430_v19 = vmul.f32 %v366_v9, %v326_v8  ;;  %v431_v20 = vmul.f32 %v367_v11, %v327_v10  ;;  %v332_v28 = vld [vmem:[%s2121_s7 + $0x40] sm:$0xff]  ;;  %v333_v29 = vld [vmem:[%s2121_s7 + $0x48] sm:$0xff]  ;;  %v334_v32 = vld [vmem:[%s2121_s7 + $0x50] sm:$0xff] }
  0x14   : > { %v432_v25 = vmul.f32 %v368_v13, %v328_v12  ;;  %v433_v26 = vmul.f32 %v369_v15, %v329_v14  ;;  %v372_v30 = vperm.slane %v357_v23, 0  ;;  %v373_v31 = vperm.slane %v357_v23, 1  ;;  %v335_v34 = vld [vmem:[%s2121_s7 + $0x58] sm:$0xff]  ;;  %v336_v44 = vld [vmem:[%s2121_s7 + $0x60] sm:$0xff]  ;;  %v337_v45 = vld [vmem:[%s2121_s7 + $0x68] sm:$0xff] }
  0x15   : > { %486 = vmatpush.msra.mxu0 %v428_v17  ;;  %506 = vmatpush.msra.mxu1 %v429_v18  ;;  %v374_v33 = vperm.slane %v357_v23, 2  ;;  %v375_v35 = vperm.slane %v357_v23, 3  ;;  %v434_v36 = vmul.f32 %v370_v16, %v330_v21  ;;  %v435_v37 = vmul.f32 %v371_v27, %v331_v22  ;;  %v338_v48 = vld [vmem:[%s2121_s7 + $0x70] sm:$0xff]  ;;  %v339_v49 = vld [vmem:[%s2121_s7 + $0x78] sm:$0xff]  ;;  %v340_v57 = vld [vmem:[%s2121_s7 + $0x80] sm:$0xff] }
  0x16   : > { %1115 = vperm.xlu0 %2030, %v1112_v2   ;;  %526 = vmatpush.msra.mxu2 %v430_v19  ;;  %v436_v38 = vmul.f32 %v372_v30, %v332_v28  ;;  %v437_v39 = vmul.f32 %v373_v31, %v333_v29  ;;  %v376_v42 = vperm.slane %v357_v23, 4  ;;  %v377_v43 = vperm.slane %v357_v23, 5  ;;  %v358_v54 = vld [vmem:[%s2126_s10 + $0x10] sm:$0xff]  ;;  %v341_v58 = vld [vmem:[%s2121_s7 + $0x88] sm:$0xff]  ;;  %v343_v62 = vld [vmem:[%s2121_s7 + $0x98] sm:$0xff] }
  0x17   : > { %546 = vmatpush.msra.mxu3 %v431_v20  ;;  %1937 = vmatmul.msk.f32.vlgmr.msra.gmra.mxu0 %vm467_vm0, %v2144_v24  ;;  %v438_v40 = vmul.f32 %v374_v33, %v334_v32  ;;  %v439_v41 = vmul.f32 %v375_v35, %v335_v34  ;;  %v378_v46 = vperm.slane %v357_v23, 6  ;;  %v379_v47 = vperm.slane %v357_v23, 7  ;;  %v342_v61 = vld [vmem:[%s2121_s7 + $0x90] sm:$0xff]  ;;  %v344_v5 = vld [vmem:[%s2121_s7 + $0xa0] sm:$0xff]  ;;  %v345_v6 = vld [vmem:[%s2121_s7 + $0xa8] sm:$0xff] }
  0x18   : > { %1938 = vmatmul.msk.f32.vlgmr.msra.gmra.mxu1 %vm467_vm0, %v2144_v24  ;;  %1939 = vmatmul.msk.f32.vlgmr.msra.gmra.mxu2 %vm467_vm0, %v2144_v24  ;;  %v440_v50 = vmul.f32 %v376_v42, %v336_v44  ;;  %v441_v51 = vmul.f32 %v377_v43, %v337_v45  ;;  %v380_v55 = vperm.slane %v358_v54, 0  ;;  %v381_v56 = vperm.slane %v358_v54, 1  ;;  %v346_v9 = vld [vmem:[%s2121_s7 + $0xb0] sm:$0xff]  ;;  %v347_v10 = vld [vmem:[%s2121_s7 + $0xb8] sm:$0xff]  ;;  %v348_v18 = vld [vmem:[%s2121_s7 + $0xc0] sm:$0xff] }
  0x19   : > { %1940 = vmatmul.msk.f32.vlgmr.msra.gmra.mxu3 %vm467_vm0, %v2144_v24  ;;  %566 = vmatpush.msrb.mxu0 %v432_v25  ;;  %v442_v52 = vmul.f32 %v378_v46, %v338_v48  ;;  %v443_v53 = vmul.f32 %v379_v47, %v339_v49  ;;  %v382_v59 = vperm.slane %v358_v54, 2  ;;  %v383_v60 = vperm.slane %v358_v54, 3  ;;  %v359_v15 = vld [vmem:[%s2126_s10 + $0x18] sm:$0xff]  ;;  %v349_v19 = vld [vmem:[%s2121_s7 + $0xc8] sm:$0xff]  ;;  %v350_v22 = vld [vmem:[%s2121_s7 + $0xd0] sm:$0xff] }
  0x1a   : > { %586 = vmatpush.msrb.mxu1 %v433_v26  ;;  %606 = vmatpush.msrb.mxu2 %v434_v36  ;;  %v444_v63 = vmul.f32 %v380_v55, %v340_v57  ;;  %v445_v0 = vmul.f32 %v381_v56, %v341_v58  ;;  %v384_v3 = vperm.slane %v358_v54, 4  ;;  %v385_v4 = vperm.slane %v358_v54, 5  ;;  %v351_v23 = vld [vmem:[%s2121_s7 + $0xd8] sm:$0xff]  ;;  %v352_v31 = vld [vmem:[%s2121_s7 + $0xe0] sm:$0xff]  ;;  %v353_v32 = vld [vmem:[%s2121_s7 + $0xe8] sm:$0xff] }
  0x1b   : > { %626 = vmatpush.msrb.mxu3 %v435_v37  ;;  %646 = vmatpush.msra.mxu0 %v436_v38  ;;  %v446_v1 = vmul.f32 %v382_v59, %v342_v61  ;;  %v447_v2 = vmul.f32 %v383_v60, %v343_v62  ;;  %v386_v7 = vperm.slane %v358_v54, 6  ;;  %v387_v8 = vperm.slane %v358_v54, 7  ;;  %v354_v35 = vld [vmem:[%s2121_s7 + $0xf0] sm:$0xff]  ;;  %v355_v36 = vld [vmem:[%s2121_s7 + $0xf8] sm:$0xff]  ;;  %v2243_v46 = vld [vmem:[%s2425_s4] sm:$0xff] }
  0x1c   : > { %666 = vmatpush.msra.mxu1 %v437_v39  ;;  %686 = vmatpush.msra.mxu2 %v438_v40  ;;  %v448_v11 = vmul.f32 %v384_v3, %v344_v5  ;;  %v449_v12 = vmul.f32 %v385_v4, %v345_v6  ;;  %v388_v16 = vperm.slane %v359_v15, 0  ;;  %v389_v17 = vperm.slane %v359_v15, 1 }
  0x1d   : > { %706 = vmatpush.msra.mxu3 %v439_v41  ;;  %v450_v13 = vmul.f32 %v386_v7, %v346_v9  ;;  %v451_v14 = vmul.f32 %v387_v8, %v347_v10  ;;  %v390_v20 = vperm.slane %v359_v15, 2  ;;  %v391_v21 = vperm.slane %v359_v15, 3 }
  0x1e   : > { %v452_v25 = vmul.f32 %v388_v16, %v348_v18  ;;  %v453_v26 = vmul.f32 %v389_v17, %v349_v19  ;;  %v392_v29 = vperm.slane %v359_v15, 4  ;;  %v393_v30 = vperm.slane %v359_v15, 5 }
  0x1f   : > { %1941 = vmatmul.msk.f32.vlgmr.msrb.gmra.mxu0 %vm467_vm0, %v2144_v24  ;;  %v454_v27 = vmul.f32 %v390_v20, %v350_v22  ;;  %v455_v28 = vmul.f32 %v391_v21, %v351_v23  ;;  %v394_v33 = vperm.slane %v359_v15, 6  ;;  %v395_v34 = vperm.slane %v359_v15, 7 }
  0x20   : > { %1942 = vmatmul.msk.f32.vlgmr.msrb.gmra.mxu1 %vm467_vm0, %v2144_v24  ;;  %1943 = vmatmul.msk.f32.vlgmr.msrb.gmra.mxu2 %vm467_vm0, %v2144_v24  ;;  %v456_v37 = vmul.f32 %v392_v29, %v352_v31  ;;  %v457_v38 = vmul.f32 %v393_v30, %v353_v32 }
  0x21   : > { %1944 = vmatmul.msk.f32.vlgmr.msrb.gmra.mxu3 %vm467_vm0, %v2144_v24  ;;  %726 = vmatpush.msrb.mxu0 %v440_v50  ;;  %v458_v39 = vmul.f32 %v394_v33, %v354_v35  ;;  %v459_v40 = vmul.f32 %v395_v34, %v355_v36 }
  0x22   : > { %746 = vmatpush.msrb.mxu1 %v441_v51  ;;  %766 = vmatpush.msrb.mxu2 %v442_v52 }
  0x23   : > { %786 = vmatpush.msrb.mxu3 %v443_v53 }
  0x27   : > { %1945 = vmatmul.msk.f32.vlgmr.msra.gmra.mxu0 %vm467_vm0, %v2144_v24 }
  0x28   : > { %1946 = vmatmul.msk.f32.vlgmr.msra.gmra.mxu1 %vm467_vm0, %v2144_v24  ;;  %1947 = vmatmul.msk.f32.vlgmr.msra.gmra.mxu2 %vm467_vm0, %v2144_v24 }
  0x29   : > { %1948 = vmatmul.msk.f32.vlgmr.msra.gmra.mxu3 %vm467_vm0, %v2144_v24  ;;  %806 = vmatpush.msra.mxu0 %v444_v63 }
  0x2a   : > { %826 = vmatpush.msra.mxu1 %v445_v0  ;;  %846 = vmatpush.msra.mxu2 %v446_v1 }
  0x2b   : > { %866 = vmatpush.msra.mxu3 %v447_v2 }
  0x2f   : > { %1949 = vmatmul.msk.f32.vlgmr.msrb.gmra.mxu0 %vm467_vm0, %v2144_v24 }
  0x30   : > { %1950 = vmatmul.msk.f32.vlgmr.msrb.gmra.mxu1 %vm467_vm0, %v2144_v24  ;;  %1951 = vmatmul.msk.f32.vlgmr.msrb.gmra.mxu2 %vm467_vm0, %v2144_v24 }
  0x31   : > { %1952 = vmatmul.msk.f32.vlgmr.msrb.gmra.mxu3 %vm467_vm0, %v2144_v24  ;;  %886 = vmatpush.msrb.mxu0 %v448_v11 }
  0x32   : > { %906 = vmatpush.msrb.mxu1 %v449_v12  ;;  %926 = vmatpush.msrb.mxu2 %v450_v13 }
  0x33   : > { %946 = vmatpush.msrb.mxu3 %v451_v14 }
  0x37   : > { %1953 = vmatmul.msk.f32.vlgmr.msra.gmra.mxu0 %vm467_vm0, %v2144_v24 }
  0x38   : > { %1954 = vmatmul.msk.f32.vlgmr.msra.gmra.mxu1 %vm467_vm0, %v2144_v24  ;;  %1955 = vmatmul.msk.f32.vlgmr.msra.gmra.mxu2 %vm467_vm0, %v2144_v24 }
  0x39   : > { %1956 = vmatmul.msk.f32.vlgmr.msra.gmra.mxu3 %vm467_vm0, %v2144_v24  ;;  %966 = vmatpush.msra.mxu0 %v452_v25 }
  0x3a   : > { %986 = vmatpush.msra.mxu1 %v453_v26  ;;  %1006 = vmatpush.msra.mxu2 %v454_v27 }
  0x3b   : > { %1026 = vmatpush.msra.mxu3 %v455_v28 }
  0x3f   : > { %1957 = vmatmul.msk.f32.vlgmr.msrb.gmra.mxu0 %vm467_vm0, %v2144_v24 }
  0x40   : > { %1958 = vmatmul.msk.f32.vlgmr.msrb.gmra.mxu1 %vm467_vm0, %v2144_v24  ;;  %1959 = vmatmul.msk.f32.vlgmr.msrb.gmra.mxu2 %vm467_vm0, %v2144_v24 }
  0x41   : > { %1960 = vmatmul.msk.f32.vlgmr.msrb.gmra.mxu3 %vm467_vm0, %v2144_v24  ;;  %1046 = vmatpush.msrb.mxu0 %v456_v37 }
  0x42   : > { %1066 = vmatpush.msrb.mxu1 %v457_v38  ;;  %1086 = vmatpush.msrb.mxu2 %v458_v39 }
  0x43   : > { %1106 = vmatpush.msrb.mxu3 %v459_v40 }
  0x47   : > { %1961 = vmatmul.msk.f32.vlgmr.msra.gmra.mxu0 %vm467_vm0, %v2144_v24 }
  0x48   : > { %1962 = vmatmul.msk.f32.vlgmr.msra.gmra.mxu1 %vm467_vm0, %v2144_v24  ;;  %1963 = vmatmul.msk.f32.vlgmr.msra.gmra.mxu2 %vm467_vm0, %v2144_v24 }
  0x49   : > { %1964 = vmatmul.msk.f32.vlgmr.msra.gmra.mxu3 %vm467_vm0, %v2144_v24 }
  0x4f   : > { %1965 = vmatmul.msk.f32.vlgmr.msrb.gmra.mxu0 %vm467_vm0, %v2144_v24 }
  0x50   : > { %1966 = vmatmul.msk.f32.vlgmr.msrb.gmra.mxu1 %vm467_vm0, %v2144_v24  ;;  %1967 = vmatmul.msk.f32.vlgmr.msrb.gmra.mxu2 %vm467_vm0, %v2144_v24 }
  0x51   : > { %1968 = vmatmul.msk.f32.vlgmr.msrb.gmra.mxu3 %vm467_vm0, %v2144_v24 }
  0x80   : > { %v2236_v41 = vpop.permute.xlu0 %464 }
  0x94   : > { %v488_v42 = vpop.f32.mrf.mxu0 }
  0x95   : > { %v508_v43 = vpop.f32.mrf.mxu1  ;;  %v489_v44 = vadd.f32 %v488_v42, %v2236_v41 }
  0x96   : > { %v509_v45 = vadd.f32 %v508_v43, %v2236_v41 }
  0x97   : > { %1136 = vmatpush.msra.mxu0 %v489_v44  ;;  %v2339_v44 = vpop.permute.xlu0 %1115 }
  0x98   : > { %1156 = vmatpush.msra.mxu1 %v509_v45  ;;  %1969 = vmatmul.msk.f32.vlgmr.msra.gmra.mxu0 %vm467_vm0, %v2243_v46 }
  0x99   : > { %1970 = vmatmul.msk.f32.vlgmr.msra.gmra.mxu1 %vm467_vm0, %v2243_v46 }
  0x9b   : > { %v528_v24 = vpop.f32.mrf.mxu2 }
  0x9c   : > { %v548_v47 = vpop.f32.mrf.mxu3  ;;  %v529_v48 = vadd.f32 %v528_v24, %v2236_v41  ;;  %v568_v50 = vpop.f32.mrf.mxu0 }
  0x9d   : > { %v549_v49 = vadd.f32 %v548_v47, %v2236_v41  ;;  %v588_v51 = vpop.f32.mrf.mxu1  ;;  %v569_v52 = vadd.f32 %v568_v50, %v2236_v41 }
  0x9e   : > { %v589_v53 = vadd.f32 %v588_v51, %v2236_v41  ;;  %1176 = vmatpush.msra.mxu2 %v529_v48 }
  0x9f   : > { %1196 = vmatpush.msra.mxu3 %v549_v49  ;;  %1971 = vmatmul.msk.f32.vlgmr.msra.gmra.mxu2 %vm467_vm0, %v2243_v46 }
  0xa0   : > { %1972 = vmatmul.msk.f32.vlgmr.msra.gmra.mxu3 %vm467_vm0, %v2243_v46  ;;  %1216 = vmatpush.msrb.mxu0 %v569_v52 }
  0xa1   : > { %1236 = vmatpush.msrb.mxu1 %v589_v53  ;;  %1973 = vmatmul.msk.f32.vlgmr.msrb.gmra.mxu0 %vm467_vm0, %v2243_v46 }
  0xa2   : > { %1974 = vmatmul.msk.f32.vlgmr.msrb.gmra.mxu1 %vm467_vm0, %v2243_v46 }
  0xa3   : > { %v608_v54 = vpop.f32.mrf.mxu2 }
  0xa4   : > { %v628_v55 = vpop.f32.mrf.mxu3  ;;  %v609_v56 = vadd.f32 %v608_v54, %v2236_v41  ;;  %v648_v58 = vpop.f32.mrf.mxu0 }
  0xa5   : > { %v629_v57 = vadd.f32 %v628_v55, %v2236_v41  ;;  %v668_v59 = vpop.f32.mrf.mxu1  ;;  %v649_v60 = vadd.f32 %v648_v58, %v2236_v41 }
  0xa6   : > { %v669_v61 = vadd.f32 %v668_v59, %v2236_v41  ;;  %1256 = vmatpush.msrb.mxu2 %v609_v56 }
  0xa7   : > { %1276 = vmatpush.msrb.mxu3 %v629_v57  ;;  %1975 = vmatmul.msk.f32.vlgmr.msrb.gmra.mxu2 %vm467_vm0, %v2243_v46 }
  0xa8   : > { %1976 = vmatmul.msk.f32.vlgmr.msrb.gmra.mxu3 %vm467_vm0, %v2243_v46  ;;  %1296 = vmatpush.msra.mxu0 %v649_v60 }
  0xa9   : > { %1316 = vmatpush.msra.mxu1 %v669_v61  ;;  %1977 = vmatmul.msk.f32.vlgmr.msra.gmra.mxu0 %vm467_vm0, %v2243_v46 }
  0xaa   : > { %1978 = vmatmul.msk.f32.vlgmr.msra.gmra.mxu1 %vm467_vm0, %v2243_v46 }
  0xab   : > { %v688_v62 = vpop.f32.mrf.mxu2 }
  0xac   : > { %v708_v63 = vpop.f32.mrf.mxu3  ;;  %v689_v0 = vadd.f32 %v688_v62, %v2236_v41  ;;  %v728_v2 = vpop.f32.mrf.mxu0 }
  0xad   : > { %v709_v1 = vadd.f32 %v708_v63, %v2236_v41  ;;  %v748_v3 = vpop.f32.mrf.mxu1  ;;  %v729_v4 = vadd.f32 %v728_v2, %v2236_v41 }
  0xae   : > { %v749_v5 = vadd.f32 %v748_v3, %v2236_v41  ;;  %1336 = vmatpush.msra.mxu2 %v689_v0 }
  0xaf   : > { %1356 = vmatpush.msra.mxu3 %v709_v1  ;;  %1979 = vmatmul.msk.f32.vlgmr.msra.gmra.mxu2 %vm467_vm0, %v2243_v46 }
  0xb0   : > { %1980 = vmatmul.msk.f32.vlgmr.msra.gmra.mxu3 %vm467_vm0, %v2243_v46  ;;  %1376 = vmatpush.msrb.mxu0 %v729_v4 }
  0xb1   : > { %1396 = vmatpush.msrb.mxu1 %v749_v5  ;;  %1981 = vmatmul.msk.f32.vlgmr.msrb.gmra.mxu0 %vm467_vm0, %v2243_v46 }
  0xb2   : > { %1982 = vmatmul.msk.f32.vlgmr.msrb.gmra.mxu1 %vm467_vm0, %v2243_v46 }
  0xb3   : > { %v768_v6 = vpop.f32.mrf.mxu2 }
  0xb4   : > { %v788_v7 = vpop.f32.mrf.mxu3  ;;  %v769_v8 = vadd.f32 %v768_v6, %v2236_v41  ;;  %v808_v10 = vpop.f32.mrf.mxu0 }
  0xb5   : > { %v789_v9 = vadd.f32 %v788_v7, %v2236_v41  ;;  %v828_v11 = vpop.f32.mrf.mxu1  ;;  %v809_v12 = vadd.f32 %v808_v10, %v2236_v41 }
  0xb6   : > { %v829_v13 = vadd.f32 %v828_v11, %v2236_v41  ;;  %1416 = vmatpush.msrb.mxu2 %v769_v8 }
  0xb7   : > { %1436 = vmatpush.msrb.mxu3 %v789_v9  ;;  %1983 = vmatmul.msk.f32.vlgmr.msrb.gmra.mxu2 %vm467_vm0, %v2243_v46 }
  0xb8   : > { %1984 = vmatmul.msk.f32.vlgmr.msrb.gmra.mxu3 %vm467_vm0, %v2243_v46  ;;  %1456 = vmatpush.msra.mxu0 %v809_v12 }
  0xb9   : > { %1476 = vmatpush.msra.mxu1 %v829_v13  ;;  %1985 = vmatmul.msk.f32.vlgmr.msra.gmra.mxu0 %vm467_vm0, %v2243_v46 }
  0xba   : > { %1986 = vmatmul.msk.f32.vlgmr.msra.gmra.mxu1 %vm467_vm0, %v2243_v46 }
  0xbb   : > { %v848_v14 = vpop.f32.mrf.mxu2 }
  0xbc   : > { %v868_v15 = vpop.f32.mrf.mxu3  ;;  %v849_v16 = vadd.f32 %v848_v14, %v2236_v41  ;;  %v888_v18 = vpop.f32.mrf.mxu0 }
  0xbd   : > { %v869_v17 = vadd.f32 %v868_v15, %v2236_v41  ;;  %v908_v19 = vpop.f32.mrf.mxu1  ;;  %v889_v20 = vadd.f32 %v888_v18, %v2236_v41 }
  0xbe   : > { %v909_v21 = vadd.f32 %v908_v19, %v2236_v41  ;;  %1496 = vmatpush.msra.mxu2 %v849_v16 }
  0xbf   : > { %1516 = vmatpush.msra.mxu3 %v869_v17  ;;  %1987 = vmatmul.msk.f32.vlgmr.msra.gmra.mxu2 %vm467_vm0, %v2243_v46 }
  0xc0   : > { %1988 = vmatmul.msk.f32.vlgmr.msra.gmra.mxu3 %vm467_vm0, %v2243_v46  ;;  %1536 = vmatpush.msrb.mxu0 %v889_v20 }
  0xc1   : > { %1556 = vmatpush.msrb.mxu1 %v909_v21  ;;  %1989 = vmatmul.msk.f32.vlgmr.msrb.gmra.mxu0 %vm467_vm0, %v2243_v46 }
  0xc2   : > { %1990 = vmatmul.msk.f32.vlgmr.msrb.gmra.mxu1 %vm467_vm0, %v2243_v46 }
  0xc3   : > { %v928_v22 = vpop.f32.mrf.mxu2 }
  0xc4   : > { %v948_v23 = vpop.f32.mrf.mxu3  ;;  %v929_v25 = vadd.f32 %v928_v22, %v2236_v41  ;;  %v968_v27 = vpop.f32.mrf.mxu0 }
  0xc5   : > { %v949_v26 = vadd.f32 %v948_v23, %v2236_v41  ;;  %v988_v28 = vpop.f32.mrf.mxu1  ;;  %v969_v29 = vadd.f32 %v968_v27, %v2236_v41 }
  0xc6   : > { %v989_v30 = vadd.f32 %v988_v28, %v2236_v41  ;;  %1576 = vmatpush.msrb.mxu2 %v929_v25 }
  0xc7   : > { %1596 = vmatpush.msrb.mxu3 %v949_v26  ;;  %1991 = vmatmul.msk.f32.vlgmr.msrb.gmra.mxu2 %vm467_vm0, %v2243_v46 }
  0xc8   : > { %1992 = vmatmul.msk.f32.vlgmr.msrb.gmra.mxu3 %vm467_vm0, %v2243_v46  ;;  %1616 = vmatpush.msra.mxu0 %v969_v29 }
  0xc9   : > { %1636 = vmatpush.msra.mxu1 %v989_v30  ;;  %1993 = vmatmul.msk.f32.vlgmr.msra.gmra.mxu0 %vm467_vm0, %v2243_v46 }
  0xca   : > { %1994 = vmatmul.msk.f32.vlgmr.msra.gmra.mxu1 %vm467_vm0, %v2243_v46 }
  0xcb   : > { %v1008_v31 = vpop.f32.mrf.mxu2 }
  0xcc   : > { %v1028_v32 = vpop.f32.mrf.mxu3  ;;  %v1009_v33 = vadd.f32 %v1008_v31, %v2236_v41  ;;  %v1048_v35 = vpop.f32.mrf.mxu0 }
  0xcd   : > { %v1029_v34 = vadd.f32 %v1028_v32, %v2236_v41  ;;  %v1068_v36 = vpop.f32.mrf.mxu1  ;;  %v1049_v37 = vadd.f32 %v1048_v35, %v2236_v41 }
  0xce   : > { %v1069_v38 = vadd.f32 %v1068_v36, %v2236_v41  ;;  %1656 = vmatpush.msra.mxu2 %v1009_v33 }
  0xcf   : > { %1676 = vmatpush.msra.mxu3 %v1029_v34  ;;  %1995 = vmatmul.msk.f32.vlgmr.msra.gmra.mxu2 %vm467_vm0, %v2243_v46 }
  0xd0   : > { %1996 = vmatmul.msk.f32.vlgmr.msra.gmra.mxu3 %vm467_vm0, %v2243_v46  ;;  %1696 = vmatpush.msrb.mxu0 %v1049_v37 }
  0xd1   : > { %1716 = vmatpush.msrb.mxu1 %v1069_v38  ;;  %1997 = vmatmul.msk.f32.vlgmr.msrb.gmra.mxu0 %vm467_vm0, %v2243_v46 }
  0xd2   : > { %1998 = vmatmul.msk.f32.vlgmr.msrb.gmra.mxu1 %vm467_vm0, %v2243_v46 }
  0xd3   : > { %v1088_v39 = vpop.f32.mrf.mxu2 }
  0xd4   : > { %v1108_v40 = vpop.f32.mrf.mxu3  ;;  %v1089_v42 = vadd.f32 %v1088_v39, %v2236_v41 }
  0xd5   : > { %v1109_v43 = vadd.f32 %v1108_v40, %v2236_v41 }
  0xd6   : > { %1736 = vmatpush.msrb.mxu2 %v1089_v42 }
  0xd7   : > { %1756 = vmatpush.msrb.mxu3 %v1109_v43  ;;  %1999 = vmatmul.msk.f32.vlgmr.msrb.gmra.mxu2 %vm467_vm0, %v2243_v46 }
  0xd8   : > { %2000 = vmatmul.msk.f32.vlgmr.msrb.gmra.mxu3 %vm467_vm0, %v2243_v46 }
 0x115   : > { %v1138_v45 = vpop.f32.mrf.mxu0 }
 0x116   : > { %v1158_v24 = vpop.f32.mrf.mxu1  ;;  %v1139_v47 = vadd.f32 %v1138_v45, %v2339_v44 }
 0x117   : > { %v1159_v48 = vadd.f32 %v1158_v24, %v2339_v44 }
 0x118   : > { %v1761_v41 = vmax.f32 %v1139_v47, 0.0 }
 0x119   : > { %v1762_v46 = vmax.f32 %v1159_v48, 0.0 }
 0x11a   : > { %1793 = vst [vmem:[%s2348_s19] sm:$0xff] %v1761_v41 }
 0x11b   : > { %1794 = vst [vmem:[%s2348_s19 + $0x8] sm:$0xff] %v1762_v46 }
 0x11e   : > { %v1218_v49 = vpop.f32.mrf.mxu0 }
 0x11f   : > { %v1238_v50 = vpop.f32.mrf.mxu1  ;;  %v1219_v51 = vadd.f32 %v1218_v49, %v2339_v44 }
 0x120   : > { %v1239_v52 = vadd.f32 %v1238_v50, %v2339_v44 }
 0x121   : > { %v1765_v53 = vmax.f32 %v1219_v51, 0.0 }
 0x122   : > { %v1766_v54 = vmax.f32 %v1239_v52, 0.0  ;;  %v1178_v55 = vpop.f32.mrf.mxu2 }
 0x123   : > { %v1198_v56 = vpop.f32.mrf.mxu3  ;;  %1797 = vst [vmem:[%s2348_s19 + $0x20] sm:$0xff] %v1765_v53  ;;  %v1179_v57 = vadd.f32 %v1178_v55, %v2339_v44 }
 0x124   : > { %v1199_v58 = vadd.f32 %v1198_v56, %v2339_v44  ;;  %1798 = vst [vmem:[%s2348_s19 + $0x28] sm:$0xff] %v1766_v54 }
 0x125   : > { %v1763_v59 = vmax.f32 %v1179_v57, 0.0 }
 0x126   : > { %v1764_v60 = vmax.f32 %v1199_v58, 0.0  ;;  %v1298_v61 = vpop.f32.mrf.mxu0 }
 0x127   : > { %v1318_v62 = vpop.f32.mrf.mxu1  ;;  %1795 = vst [vmem:[%s2348_s19 + $0x10] sm:$0xff] %v1763_v59  ;;  %v1299_v63 = vadd.f32 %v1298_v61, %v2339_v44 }
 0x128   : > { %v1319_v0 = vadd.f32 %v1318_v62, %v2339_v44  ;;  %1796 = vst [vmem:[%s2348_s19 + $0x18] sm:$0xff] %v1764_v60 }
 0x129   : > { %v1769_v1 = vmax.f32 %v1299_v63, 0.0 }
 0x12a   : > { %v1770_v2 = vmax.f32 %v1319_v0, 0.0  ;;  %v1258_v3 = vpop.f32.mrf.mxu2 }
 0x12b   : > { %v1278_v4 = vpop.f32.mrf.mxu3  ;;  %1801 = vst [vmem:[%s2348_s19 + $0x40] sm:$0xff] %v1769_v1  ;;  %v1259_v5 = vadd.f32 %v1258_v3, %v2339_v44 }
 0x12c   : > { %v1279_v6 = vadd.f32 %v1278_v4, %v2339_v44  ;;  %1802 = vst [vmem:[%s2348_s19 + $0x48] sm:$0xff] %v1770_v2 }
 0x12d   : > { %v1767_v7 = vmax.f32 %v1259_v5, 0.0 }
 0x12e   : > { %v1768_v8 = vmax.f32 %v1279_v6, 0.0  ;;  %v1378_v9 = vpop.f32.mrf.mxu0 }
 0x12f   : > { %v1398_v10 = vpop.f32.mrf.mxu1  ;;  %1799 = vst [vmem:[%s2348_s19 + $0x30] sm:$0xff] %v1767_v7  ;;  %v1379_v11 = vadd.f32 %v1378_v9, %v2339_v44 }
 0x130   : > { %v1399_v12 = vadd.f32 %v1398_v10, %v2339_v44  ;;  %1800 = vst [vmem:[%s2348_s19 + $0x38] sm:$0xff] %v1768_v8 }
 0x131   : > { %v1773_v13 = vmax.f32 %v1379_v11, 0.0 }
 0x132   : > { %v1774_v14 = vmax.f32 %v1399_v12, 0.0  ;;  %v1338_v15 = vpop.f32.mrf.mxu2 }
 0x133   : > { %v1358_v16 = vpop.f32.mrf.mxu3  ;;  %1805 = vst [vmem:[%s2348_s19 + $0x60] sm:$0xff] %v1773_v13  ;;  %v1339_v17 = vadd.f32 %v1338_v15, %v2339_v44 }
 0x134   : > { %v1359_v18 = vadd.f32 %v1358_v16, %v2339_v44  ;;  %1806 = vst [vmem:[%s2348_s19 + $0x68] sm:$0xff] %v1774_v14 }
 0x135   : > { %v1771_v19 = vmax.f32 %v1339_v17, 0.0 }
 0x136   : > { %v1772_v20 = vmax.f32 %v1359_v18, 0.0  ;;  %v1458_v21 = vpop.f32.mrf.mxu0 }
 0x137   : > { %v1478_v22 = vpop.f32.mrf.mxu1  ;;  %1803 = vst [vmem:[%s2348_s19 + $0x50] sm:$0xff] %v1771_v19  ;;  %v1459_v23 = vadd.f32 %v1458_v21, %v2339_v44 }
 0x138   : > { %v1479_v25 = vadd.f32 %v1478_v22, %v2339_v44  ;;  %1804 = vst [vmem:[%s2348_s19 + $0x58] sm:$0xff] %v1772_v20 }
 0x139   : > { %v1777_v26 = vmax.f32 %v1459_v23, 0.0 }
 0x13a   : > { %v1778_v27 = vmax.f32 %v1479_v25, 0.0  ;;  %v1418_v28 = vpop.f32.mrf.mxu2 }
 0x13b   : > { %v1438_v29 = vpop.f32.mrf.mxu3  ;;  %1809 = vst [vmem:[%s2348_s19 + $0x80] sm:$0xff] %v1777_v26  ;;  %v1419_v30 = vadd.f32 %v1418_v28, %v2339_v44 }
 0x13c   : > { %v1439_v31 = vadd.f32 %v1438_v29, %v2339_v44  ;;  %1810 = vst [vmem:[%s2348_s19 + $0x88] sm:$0xff] %v1778_v27 }
 0x13d   : > { %v1775_v32 = vmax.f32 %v1419_v30, 0.0 }
 0x13e   : > { %v1776_v33 = vmax.f32 %v1439_v31, 0.0  ;;  %v1538_v34 = vpop.f32.mrf.mxu0 }
 0x13f   : > { %v1558_v35 = vpop.f32.mrf.mxu1  ;;  %1807 = vst [vmem:[%s2348_s19 + $0x70] sm:$0xff] %v1775_v32  ;;  %v1539_v36 = vadd.f32 %v1538_v34, %v2339_v44 }
 0x140   : > { %v1559_v37 = vadd.f32 %v1558_v35, %v2339_v44  ;;  %1808 = vst [vmem:[%s2348_s19 + $0x78] sm:$0xff] %v1776_v33 }
 0x141   : > { %v1781_v38 = vmax.f32 %v1539_v36, 0.0 }
 0x142   : > { %v1782_v39 = vmax.f32 %v1559_v37, 0.0  ;;  %v1498_v40 = vpop.f32.mrf.mxu2 }
 0x143   : > { %v1518_v42 = vpop.f32.mrf.mxu3  ;;  %1813 = vst [vmem:[%s2348_s19 + $0xa0] sm:$0xff] %v1781_v38  ;;  %v1499_v43 = vadd.f32 %v1498_v40, %v2339_v44 }
 0x144   : > { %v1519_v45 = vadd.f32 %v1518_v42, %v2339_v44  ;;  %1814 = vst [vmem:[%s2348_s19 + $0xa8] sm:$0xff] %v1782_v39 }
 0x145   : > { %v1779_v24 = vmax.f32 %v1499_v43, 0.0 }
 0x146   : > { %v1780_v47 = vmax.f32 %v1519_v45, 0.0  ;;  %v1618_v48 = vpop.f32.mrf.mxu0 }
 0x147   : > { %v1638_v41 = vpop.f32.mrf.mxu1  ;;  %1811 = vst [vmem:[%s2348_s19 + $0x90] sm:$0xff] %v1779_v24  ;;  %v1619_v46 = vadd.f32 %v1618_v48, %v2339_v44 }
 0x148   : > { %v1639_v49 = vadd.f32 %v1638_v41, %v2339_v44  ;;  %1812 = vst [vmem:[%s2348_s19 + $0x98] sm:$0xff] %v1780_v47 }
 0x149   : > { %v1785_v50 = vmax.f32 %v1619_v46, 0.0 }
 0x14a   : > { %v1786_v51 = vmax.f32 %v1639_v49, 0.0  ;;  %v1578_v52 = vpop.f32.mrf.mxu2 }
 0x14b   : > { %v1598_v53 = vpop.f32.mrf.mxu3  ;;  %1817 = vst [vmem:[%s2348_s19 + $0xc0] sm:$0xff] %v1785_v50  ;;  %v1579_v54 = vadd.f32 %v1578_v52, %v2339_v44 }
 0x14c   : > { %v1599_v55 = vadd.f32 %v1598_v53, %v2339_v44  ;;  %1818 = vst [vmem:[%s2348_s19 + $0xc8] sm:$0xff] %v1786_v51 }
 0x14d   : > { %v1783_v56 = vmax.f32 %v1579_v54, 0.0 }
 0x14e   : > { %v1784_v57 = vmax.f32 %v1599_v55, 0.0  ;;  %v1698_v58 = vpop.f32.mrf.mxu0 }
 0x14f   : > { %v1718_v59 = vpop.f32.mrf.mxu1  ;;  %1815 = vst [vmem:[%s2348_s19 + $0xb0] sm:$0xff] %v1783_v56  ;;  %v1699_v60 = vadd.f32 %v1698_v58, %v2339_v44 }
 0x150   : > { %v1719_v61 = vadd.f32 %v1718_v59, %v2339_v44  ;;  %1816 = vst [vmem:[%s2348_s19 + $0xb8] sm:$0xff] %v1784_v57 }
 0x151   : > { %v1789_v62 = vmax.f32 %v1699_v60, 0.0 }
 0x152   : > { %v1790_v63 = vmax.f32 %v1719_v61, 0.0  ;;  %v1658_v0 = vpop.f32.mrf.mxu2 }
 0x153   : > { %v1678_v1 = vpop.f32.mrf.mxu3  ;;  %1821 = vst [vmem:[%s2348_s19 + $0xe0] sm:$0xff] %v1789_v62  ;;  %v1659_v2 = vadd.f32 %v1658_v0, %v2339_v44 }
 0x154   : > { %v1679_v3 = vadd.f32 %v1678_v1, %v2339_v44  ;;  %1822 = vst [vmem:[%s2348_s19 + $0xe8] sm:$0xff] %v1790_v63 }
 0x155   : > { %v1787_v4 = vmax.f32 %v1659_v2, 0.0 }
 0x156   : > { %v1788_v5 = vmax.f32 %v1679_v3, 0.0 }
 0x157   : > { %1819 = vst [vmem:[%s2348_s19 + $0xd0] sm:$0xff] %v1787_v4 }
 0x158   : > { %1820 = vst [vmem:[%s2348_s19 + $0xd8] sm:$0xff] %v1788_v5 }
 0x15a   : > { %v1738_v6 = vpop.f32.mrf.mxu2 }
 0x15b   : > { %v1758_v7 = vpop.f32.mrf.mxu3  ;;  %v1739_v8 = vadd.f32 %v1738_v6, %v2339_v44 }
 0x15c   : > { %v1759_v9 = vadd.f32 %v1758_v7, %v2339_v44 }
 0x15d   : > { %v1791_v10 = vmax.f32 %v1739_v8, 0.0 }
 0x15e   : > { %v1792_v11 = vmax.f32 %v1759_v9, 0.0 }
 0x15f   : > { %1823 = vst [vmem:[%s2348_s19 + $0xf0] sm:$0xff] %v1791_v10 }
 0x160   : > { %1824 = vst [vmem:[%s2348_s19 + $0xf8] sm:$0xff] %v1792_v11 }
 0x161 PF: > { %s16_s23 = sadd.s32 1, %s2053_s23   ;;  %s2428_s21 = smov %s2049_s22 }
 0x162   : > { %p13_p5 = scmp.ge.s32.totalorder %s16_s23, 4   ;;  %s2429_s22 = smov %s2431_s24 }
 0x164   :  { %15 = sbr.rel (!%p13_p5) target bundleno = 2 (0x2), region = 77 }

</bundles_post_ra>
